<compile_context>
chip_gen: v7x
topology: tpu7x:2x2x1
jax: 0.10.0
libtpu: 0.0.40
codegen_flags: <defaults>
</compile_context>

<pallas_src>
import jax
import jax.numpy as jnp
from jax import lax
from jax.experimental import pallas as pl
from jax.experimental.pallas import tpu as pltpu

HIDDEN = 64
LN_EPS = 1e-5


def _round_up(n, m):
    return ((n + m - 1) // m) * m


def critic_kernel(x_ref, w1t_ref, b1_ref, w2c_ref, b2_ref, o_ref):
    # ---- Linear 1 on the MXU, transposed output (batch on lanes) ----
    # hT[j, b] = sum_k W1T[j, k] * x[b, k]            -> (64, TB) f32
    ht = lax.dot_general(
        w1t_ref[...], x_ref[...],
        dimension_numbers=(((1,), (1,)), ((), ())),   # A @ B^T form
        preferred_element_type=jnp.float32)
    # ---- bias + ReLU (VPU, f32) ----
    ht = jnp.maximum(ht + b1_ref[...], 0.0)           # b1: (64, 1) broadcast on lanes
    # ---- LayerNorm stats over hidden dim (sublane axis), biased var, eps in rsqrt ----
    mean = jnp.mean(ht, axis=0, keepdims=True)        # (1, TB)
    diff = ht - mean
    var = jnp.mean(diff * diff, axis=0, keepdims=True)
    # ---- Folded projection: sum_j diff_j * (gamma_j * w2_j), scaled by rsqrt ----
    sdot = jnp.sum(diff * w2c_ref[...], axis=0, keepdims=True)   # (1, TB)
    out = sdot * lax.rsqrt(var + LN_EPS) + b2_ref[0, 0]
    # ---- lane-dense output slab ----
    o_ref[...] = out[None].astype(o_ref.dtype)        # (1, 1, TB)


def _choose_tb(B, state_dim, x_itemsize, tb, vmem_budget_bytes):
    """Pick the per-grid-step batch tile from a VMEM byte budget."""
    sub = max(8, 32 // x_itemsize)                    # sublane granularity: f32->8, bf16->16
    # Per-row VMEM estimate: x double-buffered & lane-padded to >=128 lanes,
    # ~4 live (64, TB) f32 temporaries (hT / diff / products), double-buffered out row.
    lanes = max(128, _round_up(state_dim, 128))
    per_row = 2 * lanes * x_itemsize + 4 * HIDDEN * 4 + 2 * 4
    tb_budget = max(sub, (vmem_budget_bytes // per_row) // sub * sub)
    TB = tb_budget if tb is None else min(int(tb), tb_budget)
    TB = min(TB, _round_up(B, sub))
    TB = max(sub, _round_up(TB, sub))
    # v7x has 2 TensorCores: make the "parallel" grid axis have >=2 steps when the
    # batch is big enough to split (no-op on single-core v5e/v6e).
    if B >= 512 and _round_up(B, TB) // TB < 2:
        TB = max(sub, _round_up((B + 1) // 2, sub))
    return TB


def critic_forward(x, params, *, tb=None, x_dtype=None, vmem_budget_bytes=24 << 20):
    """x: (B, state_dim) float32. Returns (B, 1) float32.

    x_dtype=jnp.bfloat16 streams x / W1 in bf16 (f32 accumulation + f32 post-matmul
    math); default None keeps the full-f32 path matching the PyTorch module.
    """
    w1, b1, gamma, beta, w2, b2 = (
        params["w1"], params["b1"], params["gamma"],
        params["beta"], params["w2"], params["b2"],
    )
    B, state_dim = x.shape

    if x_dtype is not None:
        x = x.astype(x_dtype)
    x_itemsize = jnp.dtype(x.dtype).itemsize

    # Weight prep (all tiny; done once in the wrapper):
    w1t = jnp.transpose(w1).astype(x.dtype)                       # (64, state_dim)
    b1c = jnp.reshape(b1, (HIDDEN, 1)).astype(jnp.float32)        # (64, 1)
    # Fold LayerNorm affine into the output projection (exact identity):
    #   (hn*gamma + beta) @ w2 + b2 == hn @ (gamma ⊙ w2) + (beta @ w2 + b2)
    w2c = (jnp.reshape(gamma, (HIDDEN, 1)) *
           jnp.reshape(w2, (HIDDEN, 1))).astype(jnp.float32)      # (64, 1)
    b2f = (jnp.reshape(beta, (1, HIDDEN)) @ jnp.reshape(w2, (HIDDEN, 1))
           + jnp.reshape(b2, (1, 1))).astype(jnp.float32)         # (1, 1) scalar

    TB = _choose_tb(B, state_dim, x_itemsize, tb, vmem_budget_bytes)
    B_pad = _round_up(B, TB)
    if B_pad != B:
        x = jnp.pad(x, ((0, B_pad - B), (0, 0)))                  # pad rows, slice after
    grid = (B_pad // TB,)

    vmem_limit = int(min(56 << 20, max(32 << 20, 2 * vmem_budget_bytes)))

    out = pl.pallas_call(
        critic_kernel,
        out_shape=jax.ShapeDtypeStruct((grid[0], 1, TB), jnp.float32),
        grid=grid,
        in_specs=[
            pl.BlockSpec((TB, state_dim), lambda i: (i, 0)),          # x: pipelined
            pl.BlockSpec((HIDDEN, state_dim), lambda i: (0, 0)),      # W1^T: resident
            pl.BlockSpec((HIDDEN, 1), lambda i: (0, 0)),              # b1 column
            pl.BlockSpec((HIDDEN, 1), lambda i: (0, 0)),              # gamma*w2 column
            pl.BlockSpec((1, 1), lambda i: (0, 0),
                         memory_space=pltpu.MemorySpace.SMEM),        # folded b2 scalar
        ],
        out_specs=pl.BlockSpec((1, 1, TB), lambda i: (i, 0, 0)),      # lane-dense slab
        compiler_params=pltpu.CompilerParams(
            dimension_semantics=("parallel",),
            vmem_limit_bytes=vmem_limit),
    )(x, w1t, b1c, w2c, b2f)

    # Layout plumbing only: (steps, 1, TB) slab back to (B, 1).
    return out.reshape(B_pad, 1)[:B]


def init_params(key, state_dim):
    k1, k2, k3, k4 = jax.random.split(key, 4)
    # Weights ~ N(0, 0.1) as in the PyTorch module; biases small deterministic values.
    w1 = 0.1 * jax.random.normal(k1, (state_dim, HIDDEN), jnp.float32)
    b1 = 0.01 * jax.random.normal(k2, (1, HIDDEN), jnp.float32)
    w2 = 0.1 * jax.random.normal(k3, (HIDDEN, 1), jnp.float32)
    b2 = 0.01 * jax.random.normal(k4, (1, 1), jnp.float32)
    gamma = jnp.ones((1, HIDDEN), jnp.float32)   # LayerNorm default affine
    beta = jnp.zeros((1, HIDDEN), jnp.float32)
    return {"w1": w1, "b1": b1, "gamma": gamma, "beta": beta, "w2": w2, "b2": b2}


def critic_ref(x, p):
    h = jnp.maximum(x @ p["w1"] + p["b1"], 0.0)
    mean = jnp.mean(h, axis=-1, keepdims=True)
    var = jnp.mean((h - mean) ** 2, axis=-1, keepdims=True)
    hn = (h - mean) * lax.rsqrt(var + LN_EPS) * p["gamma"] + p["beta"]
    return hn @ p["w2"] + p["b2"]


if __name__ == "__main__":
    key = jax.random.PRNGKey(0)
    kx, kx2, kx3, kp = jax.random.split(key, 4)

    # Test 1: small primary test, full-f32 path, single grid step.
    B, state_dim = 8, 32
    x = jax.random.normal(kx, (B, state_dim), jnp.float32)
    params = init_params(kp, state_dim)
    out = jax.block_until_ready(critic_forward(x, params))
    ref = critic_ref(x, params)
    assert out.shape == (B, 1)
    assert jnp.allclose(out, ref, atol=1e-4, rtol=1e-4), (out, ref)

    # Test 2: batch not a multiple of the tile -> padded multi-step grid (TB=8, grid=(3,)).
    B2 = 20
    x2 = jax.random.normal(kx2, (B2, state_dim), jnp.float32)
    out2 = jax.block_until_ready(critic_forward(x2, params, tb=8))
    ref2 = critic_ref(x2, params)
    assert out2.shape == (B2, 1)
    assert jnp.allclose(out2, ref2, atol=1e-4, rtol=1e-4), (out2, ref2)

    # Test 3: bf16 input stream (halves HBM traffic at large B), f32 accumulation.
    B3 = 256
    x3 = jax.random.normal(kx3, (B3, state_dim), jnp.float32)
    out3 = jax.block_until_ready(critic_forward(x3, params, x_dtype=jnp.bfloat16))
    # Reference with the same bf16 input/weight quantization (accumulation stays f32).
    params_q = dict(params, w1=params["w1"].astype(jnp.bfloat16).astype(jnp.float32))
    ref3_q = critic_ref(x3.astype(jnp.bfloat16).astype(jnp.float32), params_q)
    ref3_f32 = critic_ref(x3, params)
    assert out3.shape == (B3, 1)
    assert jnp.allclose(out3, ref3_q, atol=5e-3, rtol=5e-3), (out3, ref3_q)
    assert jnp.allclose(out3, ref3_f32, atol=1e-1, rtol=1e-1)   # loose sanity vs pure f32

    print("KERNEL_OK")
</pallas_src>

<mosaic_0001>
module attributes {stable_mosaic.version = 11 : i64} {
  func.func @critic_kernel(%arg0: i32, %arg1: memref<8x32xf32, #tpu.memory_space<vmem>>, %arg2: memref<64x32xf32, #tpu.memory_space<vmem>>, %arg3: memref<64x1xf32, #tpu.memory_space<vmem>>, %arg4: memref<64x1xf32, #tpu.memory_space<vmem>>, %arg5: memref<1x1xf32, #tpu.memory_space<smem>>, %arg6: memref<1x1x8xf32, #tpu.memory_space<vmem>>) attributes {dimension_semantics = [#tpu.dimension_semantics<parallel>], iteration_bounds = array<i64: 1>, scalar_prefetch = 0 : i64, scratch_operands = 0 : i64, tpu.core_type = #tpu.core_type<tc>, window_params = [{transform_indices = @transform_0, window_bounds = array<i64: 8, 32>}, {pipeline_mode = #tpu.pipeline_mode<synchronous>, transform_indices = @transform_1, window_bounds = array<i64: 64, 32>}, {pipeline_mode = #tpu.pipeline_mode<synchronous>, transform_indices = @transform_2, window_bounds = array<i64: 64, 1>}, {pipeline_mode = #tpu.pipeline_mode<synchronous>, transform_indices = @transform_3, window_bounds = array<i64: 64, 1>}, {transform_indices = @transform_4, window_bounds = array<i64: 1, 1>}, {transform_indices = @transform_5, window_bounds = array<i64: 1, 1, 8>}]} {
    %c0 = arith.constant 0 : index
    %c0_0 = arith.constant 0 : index
    %0 = vector.load %arg2[%c0, %c0_0] : memref<64x32xf32, #tpu.memory_space<vmem>>, vector<64x32xf32>
    %c0_1 = arith.constant 0 : index
    %c0_2 = arith.constant 0 : index
    %1 = vector.load %arg1[%c0_1, %c0_2] : memref<8x32xf32, #tpu.memory_space<vmem>>, vector<8x32xf32>
    %cst = arith.constant dense<0.000000e+00> : vector<64x8xf32>
    %2 = tpu.matmul %0, %1, %cst {dimension_numbers = #tpu.dot_dimension_numbers<[1], [1], [0], [0], [0, 0, 1, 0], [], []>} : vector<64x32xf32>, vector<8x32xf32>, vector<64x8xf32> -> vector<64x8xf32>
    %c0_3 = arith.constant 0 : index
    %c0_4 = arith.constant 0 : index
    %3 = vector.load %arg3[%c0_3, %c0_4] : memref<64x1xf32, #tpu.memory_space<vmem>>, vector<64x1xf32>
    %4 = vector.broadcast %3 : vector<64x1xf32> to vector<64x8xf32>
    %5 = arith.addf %2, %4 : vector<64x8xf32>
    %cst_5 = arith.constant 0.000000e+00 : f32
    %6 = vector.broadcast %cst_5 : f32 to vector<64x8xf32>
    %7 = arith.maximumf %5, %6 : vector<64x8xf32>
    %cst_6 = arith.constant dense<0.000000e+00> : vector<8xf32>
    %8 = vector.multi_reduction <add>, %7, %cst_6 [0] : vector<64x8xf32> to vector<8xf32>
    %9 = vector.shape_cast %8 : vector<8xf32> to vector<1x8xf32>
    %cst_7 = arith.constant 6.400000e+01 : f32
    %10 = vector.broadcast %cst_7 : f32 to vector<1x8xf32>
    %11 = arith.divf %9, %10 : vector<1x8xf32>
    %12 = vector.broadcast %11 : vector<1x8xf32> to vector<64x8xf32>
    %13 = arith.subf %7, %12 : vector<64x8xf32>
    %14 = arith.mulf %13, %13 : vector<64x8xf32>
    %cst_8 = arith.constant dense<0.000000e+00> : vector<8xf32>
    %15 = vector.multi_reduction <add>, %14, %cst_8 [0] : vector<64x8xf32> to vector<8xf32>
    %16 = vector.shape_cast %15 : vector<8xf32> to vector<1x8xf32>
    %cst_9 = arith.constant 6.400000e+01 : f32
    %17 = vector.broadcast %cst_9 : f32 to vector<1x8xf32>
    %18 = arith.divf %16, %17 : vector<1x8xf32>
    %c0_10 = arith.constant 0 : index
    %c0_11 = arith.constant 0 : index
    %19 = vector.load %arg4[%c0_10, %c0_11] : memref<64x1xf32, #tpu.memory_space<vmem>>, vector<64x1xf32>
    %20 = vector.broadcast %19 : vector<64x1xf32> to vector<64x8xf32>
    %21 = arith.mulf %13, %20 : vector<64x8xf32>
    %cst_12 = arith.constant dense<0.000000e+00> : vector<8xf32>
    %22 = vector.multi_reduction <add>, %21, %cst_12 [0] : vector<64x8xf32> to vector<8xf32>
    %23 = vector.shape_cast %22 : vector<8xf32> to vector<1x8xf32>
    %cst_13 = arith.constant 9.99999974E-6 : f32
    %24 = vector.broadcast %cst_13 : f32 to vector<1x8xf32>
    %25 = arith.addf %18, %24 : vector<1x8xf32>
    %26 = math.rsqrt %25 : vector<1x8xf32>
    %27 = arith.mulf %23, %26 : vector<1x8xf32>
    %c0_14 = arith.constant 0 : index
    %c0_15 = arith.constant 0 : index
    %28 = memref.load %arg5[%c0_14, %c0_15] : memref<1x1xf32, #tpu.memory_space<smem>>
    %29 = vector.broadcast %28 : f32 to vector<1x8xf32>
    %30 = arith.addf %27, %29 : vector<1x8xf32>
    %31 = vector.shape_cast %30 : vector<1x8xf32> to vector<1x1x8xf32>
    %c0_16 = arith.constant 0 : index
    %c0_17 = arith.constant 0 : index
    %c0_18 = arith.constant 0 : index
    %32 = vector.load %arg6[%c0_16, %c0_17, %c0_18] : memref<1x1x8xf32, #tpu.memory_space<vmem>>, vector<1x1x8xf32>
    tpu.vector_store %arg6[%c0_16, %c0_17, %c0_18], %31 {strides = array<i32>} : memref<1x1x8xf32, #tpu.memory_space<vmem>>, vector<1x1x8xf32>,
    return
  }
  func.func @transform_0(%arg0: i32) -> (i32, i32) {
    %c0_i32 = arith.constant 0 : i32
    %c0_i32_0 = arith.constant 0 : i32
    return %arg0, %c0_i32 : i32, i32
  }
  func.func @transform_1(%arg0: i32) -> (i32, i32) {
    %c0_i32 = arith.constant 0 : i32
    %c0_i32_0 = arith.constant 0 : i32
    %c0_i32_1 = arith.constant 0 : i32
    return %c0_i32, %c0_i32_0 : i32, i32
  }
  func.func @transform_2(%arg0: i32) -> (i32, i32) {
    %c0_i32 = arith.constant 0 : i32
    %c0_i32_0 = arith.constant 0 : i32
    %c0_i32_1 = arith.constant 0 : i32
    return %c0_i32, %c0_i32_0 : i32, i32
  }
  func.func @transform_3(%arg0: i32) -> (i32, i32) {
    %c0_i32 = arith.constant 0 : i32
    %c0_i32_0 = arith.constant 0 : i32
    %c0_i32_1 = arith.constant 0 : i32
    return %c0_i32, %c0_i32_0 : i32, i32
  }
  func.func @transform_4(%arg0: i32) -> (i32, i32) {
    %c0_i32 = arith.constant 0 : i32
    %c0_i32_0 = arith.constant 0 : i32
    %c0_i32_1 = arith.constant 0 : i32
    return %c0_i32, %c0_i32_0 : i32, i32
  }
  func.func @transform_5(%arg0: i32) -> (i32, i32, i32) {
    %c0_i32 = arith.constant 0 : i32
    %c0_i32_0 = arith.constant 0 : i32
    %c0_i32_1 = arith.constant 0 : i32
    return %arg0, %c0_i32, %c0_i32_0 : i32, i32, i32
  }
}

</mosaic_0001>

<bundles_post_ra>
// kernel: tpu_custom_call.1
= control target key start
LH: loop header
LB: loop body
LE: loop exit
PB: predicated region body
PF: predicated region fallthrough
CT: control target
= control target key end

     0   :  { %vm79_vm0 = vcmask 261120   ;;  %v445_v7 = vmov 0   ;;  %s603_s0 = inlined_call_operand.vmem [shape: f32[8,32], index: 0, kind: input, shape index: {}]   ;;  %s604_s1 = inlined_call_operand.vmem [shape: f32[64,32], index: 1, kind: input, shape index: {}]   ;;  %s605_s2 = inlined_call_operand.vmem [shape: f32[64,1], index: 2, kind: input, shape index: {}]   ;;  %s606_s3 = inlined_call_operand.vmem [shape: f32[64,1], index: 3, kind: input, shape index: {}]   ;;  %s607_s4 = inlined_call_operand.<no memory space> [shape: f32[1,1], index: 4, kind: input, shape index: {}]   ;;  %s608_s5 = inlined_call_operand.hbm [shape: f32[1,1,8], index: 5, kind: output, shape index: {}]  }
   0x1   :  { %v30_v0 = vld [vmem:[%s603_s0] sm:$0xff]  ;;  %v23_v3 = vld [vmem:[%s604_s1 + $0x8] sm:$0xff]  ;;  %v24_v5 = vld [vmem:[%s604_s1 + $0x10] sm:$0xff]  ;;  %417 = vset.pattern.permute.xlu0 %v445_v7  ;;  %418 = vset.pattern.permute.xlu1 %v445_v7 }
   0x2   :  { %v22_v1 = vld [vmem:[%s604_s1] sm:$0xff]  ;;  %399 = vmatprep.subr.msk.mxu0 %vm79_vm0, %v30_v0  ;;  %413 = vmatprep.subr.msk.mxu1 %vm79_vm0, %v30_v0  ;;  %v27_v4 = vld [vmem:[%s604_s1 + $0x28] sm:$0xff]  ;;  %v28_v6 = vld [vmem:[%s604_s1 + $0x30] sm:$0xff] }
   0x3   :  { %v26_v2 = vld [vmem:[%s604_s1 + $0x20] sm:$0xff]  ;;  %400 = vmatpush3.xpose.msk.msra.mxu0 %vm79_vm0, %v30_v0  ;;  %414 = vmatpush3.xpose.msk.msra.mxu1 %vm79_vm0, %v30_v0  ;;  %v33_v9 = vld [vmem:[%s605_s2 + $0x10] sm:$0xff]  ;;  %v25_v10 = vld [vmem:[%s604_s1 + $0x18] sm:$0xff] }
   0x4   :  { %401 = vmatprep.mubr.msk.f32.mxu0 %vm79_vm0, %v22_v1  ;;  %407 = vmatprep.mubr.msk.f32.mxu1 %vm79_vm0, %v26_v2  ;;  %v31_v8 = vld [vmem:[%s605_s2] sm:$0xff]  ;;  %v29_v11 = vld [vmem:[%s604_s1 + $0x38] sm:$0xff]  ;;  %v32_v12 = vld [vmem:[%s605_s2 + $0x8] sm:$0xff] }
   0x5   :  { %41 = vperm.xlu0 %417, %v31_v8   ;;  %51 = vperm.xlu1 %418, %v33_v9   ;;  %v34_v13 = vld [vmem:[%s605_s2 + $0x18] sm:$0xff] }
   0x6   :  { %402 = vmatmul.mubr.msk.f32.vlgmr.msra.gmra.mrb[0].mxu0 %vm79_vm0, %v23_v3  ;;  %408 = vmatmul.mubr.msk.f32.vlgmr.msra.gmra.mrb[0].mxu1 %vm79_vm0, %v27_v4 }
   0x7   :  { %404 = vmatprep.mubr.msk.f32.mxu0 %vm79_vm0, %v24_v5  ;;  %410 = vmatprep.mubr.msk.f32.mxu1 %vm79_vm0, %v28_v6 }
   0x8   :  { %11 = vsyncpa [#allocation4], 0  ;;  %v35_v14 = vld [vmem:[%s605_s2 + $0x20] sm:$0xff]  ;;  %v36_v15 = vld [vmem:[%s605_s2 + $0x28] sm:$0xff]  ;;  %vm220_vm1 = vcmask 64512   ;;  %s446_s15 = smov [#allocation3]  }
   0x9   :  { %46 = vperm.xlu0 %417, %v32_v12   ;;  %56 = vperm.xlu1 %418, %v34_v13   ;;  %v37_v16 = vld [vmem:[%s605_s2 + $0x30] sm:$0xff]  ;;  %v38_v17 = vld [vmem:[%s605_s2 + $0x38] sm:$0xff]  ;;  %v282_v18 = vld [vmem:[%s606_s3] sm:$0xff]  ;;  %s373_s16 = sshll.u32 %s446_s15, 4  ;;  %vm365_vm2 = vcmask 57344   ;;  %s374_s16 = int_to_ptr.vmem [resolvable:$true] %s373_s16 }
   0xa   :  { %405 = vmatmul.mubr.msk.f32.gmra.mrb[2].mxu0 %vm79_vm0, %v25_v10  ;;  %411 = vmatmul.mubr.msk.f32.gmra.mrb[2].mxu1 %vm79_vm0, %v29_v11  ;;  %v283_v19 = vld [vmem:[%s606_s3 + $0x8] sm:$0xff]  ;;  %v284_v20 = vld [vmem:[%s606_s3 + $0x10] sm:$0xff]  ;;  %v285_v21 = vld [vmem:[%s606_s3 + $0x18] sm:$0xff]  ;;  %s421_s17 = scalar_lea.vmem %s374_s16, 16  ;;  %s425_s18 = scalar_lea.vmem %s374_s16, 32 }
   0xb   :  { %v286_v22 = vld [vmem:[%s606_s3 + $0x20] sm:$0xff]  ;;  %v287_v23 = vld [vmem:[%s606_s3 + $0x28] sm:$0xff]  ;;  %v288_v24 = vld [vmem:[%s606_s3 + $0x30] sm:$0xff]  ;;  %p422_p0 = scmp.ne.s32.totalorder %s374_s16, %s421_s17  ;;  %p426_p1 = scmp.lt.s32.totalorder %s374_s16, %s374_s16 }
   0xc   :  { %v289_v25 = vld [vmem:[%s606_s3 + $0x38] sm:$0xff]  ;;  %p427_p2 = scmp.lt.s32.totalorder %s425_s18, %s421_s17 }
   0xd   :  { %61 = vperm.xlu0 %417, %v35_v14   ;;  %66 = vperm.xlu1 %418, %v36_v15  }
   0xe   :  { %p428_p3 = por %p427_p2, %p426_p1 }
  0x10   :  { %p429_p4 = pnand %p428_p3, %p422_p0 }
  0x11   :  { %71 = vperm.xlu0 %417, %v37_v16   ;;  %76 = vperm.xlu1 %418, %v38_v17  }
  0x15   :  { %292 = vperm.xlu0 %417, %v282_v18   ;;  %297 = vperm.xlu1 %418, %v283_v19  }
  0x19   :  { %302 = vperm.xlu0 %417, %v284_v20   ;;  %307 = vperm.xlu1 %418, %v285_v21  }
  0x1d   :  { %312 = vperm.xlu0 %417, %v286_v22   ;;  %317 = vperm.xlu1 %418, %v287_v23  }
  0x21   :  { %322 = vperm.xlu0 %417, %v288_v24   ;;  %327 = vperm.xlu1 %418, %v289_v25  }
  0x84   :  { %v42_v26 = vpop.permute.xlu0 %41  ;;  %v52_v27 = vpop.permute.xlu1 %51 }
  0x88   :  { %v47_v28 = vpop.permute.xlu0 %46  ;;  %v57_v29 = vpop.permute.xlu1 %56 }
  0x8c   :  { %v62_v36 = vpop.permute.xlu0 %61  ;;  %v67_v37 = vpop.permute.xlu1 %66 }
  0x90   :  { %v72_v53 = vpop.permute.xlu0 %71  ;;  %v77_v57 = vpop.permute.xlu1 %76 }
  0x94   :  { %v293_v14 = vpop.permute.xlu0 %292  ;;  %v298_v16 = vpop.permute.xlu1 %297 }
  0x98   :  { %v303_v22 = vpop.permute.xlu0 %302 }
  0xd9   :  { %v403_v30 = vpop.f32.mrb[0].mxu0  ;;  %v409_v31 = vpop.f32.mrb[0].mxu1 }
  0xda   :  { %v179_v32 = vadd.f32 %v403_v30, %v47_v28  ;;  %v173_v33 = vpop.f32.mrb[1].mxu0  ;;  %v193_v34 = vpop.f32.mrb[1].mxu1  ;;  %v199_v50 = vadd.f32 %v409_v31, %v67_v37 }
  0xdb   :  { %v174_v35 = vadd.f32 %v173_v33, %v42_v26  ;;  %v194_v47 = vadd.f32 %v193_v34, %v62_v36  ;;  %v308_v30 = vpop.permute.xlu1 %307 }
  0xdc   :  { %v213_v38 = vmax.f32 %v179_v32, 0.0  ;;  %v217_v59 = vmax.f32 %v199_v50, 0.0 }
  0xdd   :  { %v212_v39 = vmax.f32 %v174_v35, 0.0  ;;  %v406_v40 = vpop.f32.mrb[2].mxu0  ;;  %v412_v41 = vpop.f32.mrb[2].mxu1  ;;  %v216_v54 = vmax.f32 %v194_v47, 0.0 }
  0xde   :  { %v222_v42 = vsel %vm220_vm1, %v213_v38, 0.0  ;;  %v189_v43 = vadd.f32 %v406_v40, %v57_v29  ;;  %v183_v44 = vpop.f32.mrb[3].mxu0  ;;  %v203_v45 = vpop.f32.mrb[3].mxu1  ;;  %v209_v61 = vadd.f32 %v412_v41, %v77_v57  ;;  %v230_v2 = vsel %vm220_vm1, %v217_v59, 0.0 }
  0xdf   :  { %v221_v46 = vsel %vm220_vm1, %v212_v39, 0.0  ;;  %v184_v48 = vadd.f32 %v183_v44, %v52_v27  ;;  %v204_v56 = vadd.f32 %v203_v45, %v72_v53  ;;  %v228_v63 = vsel %vm220_vm1, %v216_v54, 0.0  ;;  %v313_v40 = vpop.permute.xlu0 %312  ;;  %v318_v47 = vpop.permute.xlu1 %317 }
  0xe0   :  { %v223_v49 = vadd.f32 %v222_v42, %v221_v46  ;;  %v215_v51 = vmax.f32 %v189_v43, 0.0  ;;  %v219_v3 = vmax.f32 %v209_v61, 0.0 }
  0xe1   :  { %v214_v52 = vmax.f32 %v184_v48, 0.0  ;;  %v218_v0 = vmax.f32 %v204_v56, 0.0 }
  0xe2   :  { %v226_v60 = vsel %vm220_vm1, %v215_v51, 0.0  ;;  %v234_v7 = vsel %vm220_vm1, %v219_v3, 0.0 }
  0xe3   :  { %v224_v55 = vsel %vm220_vm1, %v214_v52, 0.0  ;;  %v232_v5 = vsel %vm220_vm1, %v218_v0, 0.0 }
  0xe4   :  { %v225_v58 = vadd.f32 %v224_v55, %v223_v49 }
  0xe6   :  { %v227_v62 = vadd.f32 %v226_v60, %v225_v58  ;;  %v323_v60 = vpop.permute.xlu0 %322 }
  0xe8   :  { %v229_v1 = vadd.f32 %v228_v63, %v227_v62 }
  0xea   :  { %v231_v4 = vadd.f32 %v230_v2, %v229_v1  ;;  %v328_v2 = vpop.permute.xlu1 %327 }
  0xec   :  { %v233_v6 = vadd.f32 %v232_v5, %v231_v4 }
  0xee   :  { %v235_v8 = vadd.f32 %v234_v7, %v233_v6 }
  0xf0   :  { %v236_v9 = vrot.slane %v235_v8, 4 }
  0xf2   :  { %v237_v10 = vadd.f32 %v236_v9, %v235_v8 }
  0xf4   :  { %v238_v11 = vrot.slane %v237_v10, 2 }
  0xf6   :  { %v239_v12 = vadd.f32 %v238_v11, %v237_v10 }
  0xf8   :  { %v240_v13 = vrot.slane %v239_v12, 1 }
  0xfa   :  { %v241_v15 = vadd.f32 %v240_v13, %v239_v12 }
  0xfc   :  { %v243_v17 = vmul.f32 0.015625, %v241_v15 }
  0xfe   :  { %v244_v18 = vsub.f32 %v212_v39, %v243_v17  ;;  %v245_v19 = vsub.f32 %v213_v38, %v243_v17  ;;  %v246_v20 = vsub.f32 %v214_v52, %v243_v17  ;;  %v247_v21 = vsub.f32 %v215_v51, %v243_v17 }
  0xff   :  { %v248_v23 = vsub.f32 %v216_v54, %v243_v17  ;;  %v249_v24 = vsub.f32 %v217_v59, %v243_v17  ;;  %v250_v25 = vsub.f32 %v218_v0, %v243_v17  ;;  %v251_v26 = vsub.f32 %v219_v3, %v243_v17 }
 0x100   :  { %v252_v27 = vmul.f32 %v244_v18, %v244_v18  ;;  %v253_v28 = vmul.f32 %v245_v19, %v245_v19  ;;  %v254_v29 = vmul.f32 %v246_v20, %v246_v20  ;;  %v255_v31 = vmul.f32 %v247_v21, %v247_v21 }
 0x101   :  { %v256_v34 = vmul.f32 %v248_v23, %v248_v23  ;;  %v330_v37 = vmul.f32 %v293_v14, %v244_v18  ;;  %v331_v38 = vmul.f32 %v298_v16, %v245_v19  ;;  %v332_v39 = vmul.f32 %v303_v22, %v246_v20 }
 0x102   :  { %v260_v32 = vsel %vm220_vm1, %v252_v27, 0.0  ;;  %v261_v33 = vsel %vm220_vm1, %v253_v28, 0.0  ;;  %v263_v36 = vsel %vm220_vm1, %v254_v29, 0.0  ;;  %v257_v41 = vmul.f32 %v249_v24, %v249_v24 }
 0x103   :  { %v262_v35 = vadd.f32 %v261_v33, %v260_v32  ;;  %v265_v43 = vsel %vm220_vm1, %v255_v31, 0.0  ;;  %v333_v44 = vmul.f32 %v308_v30, %v247_v21  ;;  %v338_v45 = vsel %vm220_vm1, %v330_v37, 0.0 }
 0x104   :  { %v339_v46 = vsel %vm220_vm1, %v331_v38, 0.0  ;;  %v258_v50 = vmul.f32 %v250_v25, %v250_v25  ;;  %v267_v51 = vsel %vm220_vm1, %v256_v34, 0.0  ;;  %v334_v52 = vmul.f32 %v313_v40, %v248_v23 }
 0x105   :  { %v264_v42 = vadd.f32 %v263_v36, %v262_v35  ;;  %v340_v49 = vadd.f32 %v339_v46, %v338_v45  ;;  %v341_v53 = vsel %vm220_vm1, %v332_v39, 0.0  ;;  %v259_v56 = vmul.f32 %v251_v26, %v251_v26 }
 0x106   :  { %v269_v57 = vsel %vm220_vm1, %v257_v41, 0.0  ;;  %v335_v58 = vmul.f32 %v318_v47, %v249_v24  ;;  %v343_v59 = vsel %vm220_vm1, %v333_v44, 0.0  ;;  %v271_v63 = vsel %vm220_vm1, %v258_v50, 0.0 }
 0x107   :  { %v266_v48 = vadd.f32 %v265_v43, %v264_v42  ;;  %v342_v55 = vadd.f32 %v341_v53, %v340_v49  ;;  %v336_v0 = vmul.f32 %v323_v60, %v250_v25  ;;  %v345_v1 = vsel %vm220_vm1, %v334_v52, 0.0 }
 0x108   :  { %v273_v5 = vsel %vm220_vm1, %v259_v56, 0.0  ;;  %v337_v6 = vmul.f32 %v328_v2, %v251_v26  ;;  %v347_v7 = vsel %vm220_vm1, %v335_v58, 0.0  ;;  %v363_v29 = vstv %s607_s4 }
 0x109   :  { %v268_v54 = vadd.f32 %v267_v51, %v266_v48  ;;  %v344_v62 = vadd.f32 %v343_v59, %v342_v55  ;;  %v349_v10 = vsel %vm220_vm1, %v336_v0, 0.0 }
 0x10a   :  { %v351_v13 = vsel %vm220_vm1, %v337_v6, 0.0 }
 0x10b   :  { %v270_v61 = vadd.f32 %v269_v57, %v268_v54  ;;  %v346_v4 = vadd.f32 %v345_v1, %v344_v62 }
 0x10d   :  { %v272_v3 = vadd.f32 %v271_v63, %v270_v61  ;;  %v348_v9 = vadd.f32 %v347_v7, %v346_v4 }
 0x10f   :  { %v274_v8 = vadd.f32 %v273_v5, %v272_v3  ;;  %v350_v12 = vadd.f32 %v349_v10, %v348_v9 }
 0x111   :  { %v275_v11 = vrot.slane %v274_v8, 4  ;;  %v352_v15 = vadd.f32 %v351_v13, %v350_v12 }
 0x113   :  { %v276_v14 = vadd.f32 %v275_v11, %v274_v8  ;;  %v353_v17 = vrot.slane %v352_v15, 4 }
 0x115   :  { %v277_v16 = vrot.slane %v276_v14, 2  ;;  %v354_v20 = vadd.f32 %v353_v17, %v352_v15 }
 0x117   :  { %v278_v18 = vadd.f32 %v277_v16, %v276_v14  ;;  %v355_v23 = vrot.slane %v354_v20, 2 }
 0x119   :  { %v279_v19 = vrot.slane %v278_v18, 1  ;;  %v356_v25 = vadd.f32 %v355_v23, %v354_v20 }
 0x11b   :  { %v280_v21 = vadd.f32 %v279_v19, %v278_v18  ;;  %v357_v26 = vrot.slane %v356_v25, 1 }
 0x11d   :  { %v281_v22 = vmul.f32 0.015625, %v280_v21  ;;  %v358_v27 = vadd.f32 %v357_v26, %v356_v25 }
 0x11f   :  { %v359_v24 = vadd.f32 1e-05, %v281_v22 }
 0x121   :  { %419 = vrsqrt.f32 %v359_v24 }
 0x12b   :  { %v420_v28 = vpop.eup %419 }
 0x12c   :  { %v361_v30 = vmul.f32 %v420_v28, %v358_v27 }
 0x12e   :  { %v364_v31 = vadd.f32 %v363_v29, %v361_v30 }
 0x130   :  { %366 = vst.msk [vmem:[#allocation3] sm:$0x1] %vm365_vm2, %v364_v31 }
 0x131   :  { %432 = shalt.err (!%p429_p4)
}
 0x132   :  { %s433_s20 = scalar_lea.hbm %s608_s5, 16 }
 0x133   :  { %p434_p5 = scmp.ne.s32.totalorder %s608_s5, %s433_s20  ;;  %p437_p6 = scmp.lt.u32.totalorder %s433_s20, %s608_s5 }
 0x135   :  { %p439_p7 = pnand %p437_p6, %p434_p5 }
 0x137   :  { %442 = shalt.err (!%p439_p7)
}
 0x138   :  { %376 = dma.vmem_to_hbm [thread:$0]  %s374_s16, 16, %s608_s5, [#allocation4]  }
 0x139   :  { %443 = dma.done.wait [#allocation4], 16  }
 0x13a   :  { %444 = vsyncadd [#allocation4], 4294967280 }
 0x13b   :  { %380 = vsyncpa [#allocation4], 1 }

</bundles_post_ra>
